<compile_context>
chip_gen: v6e
topology: v6e:2x2x1
jax: 0.10.0
libtpu: 0.0.40
codegen_flags: <defaults>
</compile_context>

<pallas_src>
import jax
import jax.numpy as jnp
from jax.experimental import pallas as pl
from jax.experimental.pallas import tpu as pltpu


_LANE = 128
_SUBLANE = 8
# ~2 MiB per block: with double-buffered input + output (4 live buffers) this
# stays under the default scoped VMEM limit on every generation (v5e 16 MiB,
# v6e 32 MiB, v7x 32 MiB) and sits at ~85%+ of HBM roofline for the copy
# fallback.  The fast (no-op) path does not depend on this at all.
_TARGET_BLOCK_BYTES = 2 * 1024 * 1024


def _round_up(n, m):
    return ((n + m - 1) // m) * m


# ---------------------------------------------------------------------------
# Fast path: output aliases input; kernel only pins a read/write dependency.
# ---------------------------------------------------------------------------
def _touch_kernel(x_ref, o_ref):
    pltpu.touch(x_ref)
    pltpu.touch(o_ref)


def _flatten_alias(x2d):
    return pl.pallas_call(
        _touch_kernel,
        out_shape=jax.ShapeDtypeStruct(x2d.shape, x2d.dtype),
        in_specs=[pl.BlockSpec(memory_space=pl.ANY)],
        out_specs=pl.BlockSpec(memory_space=pl.ANY),
        input_output_aliases={0: 0},
        cost_estimate=pl.CostEstimate(flops=0, transcendentals=0,
                                      bytes_accessed=0),
        compiler_params=pltpu.CompilerParams(has_side_effects=True),
    )(x2d)


# ---------------------------------------------------------------------------
# Fallback: lane/sublane-dense streaming copy (near HBM roofline).
# ---------------------------------------------------------------------------
def _copy_kernel(x_ref, o_ref):
    o_ref[...] = x_ref[...]


def _choose_slab(n, itemsize, target_block_bytes):
    """Pick a lane-dense (rows, cols) slab and a cdiv-friendly row tile."""
    cols = _LANE
    for w in (1024, 512, 256, 128):
        if n % w == 0:
            cols = w
            break
    rows = n // cols
    # Sub-32-bit dtypes pack along sublanes: keep the row tile a multiple of
    # the packing factor (8 for f32, 16 for bf16, 32 for int8/fp8).
    row_align = max(_SUBLANE, 32 // max(1, itemsize))
    bytes_per_row = cols * itemsize
    max_rows = max(1, target_block_bytes // bytes_per_row)
    if max_rows >= rows:
        tile_r = rows  # one full-height block (full-dim exemption from (8,128))
    else:
        tile_r = max(row_align, (max_rows // row_align) * row_align)
    # v7x has 2 TensorCores; guarantee >= 2 "parallel" grid steps whenever the
    # data is big enough to split (neutral on single-TC v5e/v6e).
    if tile_r == rows and rows >= 2 * row_align:
        tile_r = _round_up(pl.cdiv(rows, 2), row_align)
    return rows, cols, tile_r


def _flatten_copy(x2d, target_block_bytes):
    b, f = x2d.shape
    n = b * f
    itemsize = jnp.dtype(x2d.dtype).itemsize
    cost = pl.CostEstimate(flops=0, transcendentals=0,
                           bytes_accessed=2 * n * itemsize)
    params = pltpu.CompilerParams(dimension_semantics=("parallel",))

    if n % _LANE == 0:
        # Dense path: present the flattened data as a (rows, cols) slab with
        # cols a multiple of 128 (full-width unmasked stores) and a cdiv grid
        # over rows (masked tail block if rows % tile_r != 0).
        rows, cols, tile_r = _choose_slab(n, itemsize, target_block_bytes)
        slab = x2d.reshape(rows, cols)  # row-major, metadata-only
        out = pl.pallas_call(
            _copy_kernel,
            out_shape=jax.ShapeDtypeStruct((rows, cols), slab.dtype),
            grid=(pl.cdiv(rows, tile_r),),
            in_specs=[pl.BlockSpec((tile_r, cols), lambda i: (i, 0))],
            out_specs=pl.BlockSpec((tile_r, cols), lambda i: (i, 0)),
            input_output_aliases={0: 0},
            cost_estimate=cost,
            compiler_params=params,
        )(slab)
        return out.reshape(b, f)

    # Last resort for element counts not divisible by 128: keep the (B, F)
    # layout and tile along F with a masked tail block (bounded block size).
    # TODO(synk): a pad-to-128 + dense-slab path would avoid masked stores here.
    if f >= _LANE:
        max_lanes = max(
            _LANE,
            (target_block_bytes // max(1, b * itemsize)) // _LANE * _LANE,
        )
        tile_f = min(max_lanes, (f // _LANE) * _LANE)
    else:
        tile_f = f  # tiny feature count: single full-width block
    out = pl.pallas_call(
        _copy_kernel,
        out_shape=jax.ShapeDtypeStruct((b, f), x2d.dtype),
        grid=(pl.cdiv(f, tile_f),),
        in_specs=[pl.BlockSpec((b, tile_f), lambda j: (0, j))],
        out_specs=pl.BlockSpec((b, tile_f), lambda j: (0, j)),
        input_output_aliases={0: 0},
        cost_estimate=cost,
        compiler_params=params,
    )(x2d)
    return out


_FAST_PATH_OK = True  # flipped off once if the touch/ANY path fails to lower


def flatten_pallas(x, *, target_block_bytes=_TARGET_BLOCK_BYTES):
    """Pallas equivalent of Flatten.forward: x.view(batch_size, -1)."""
    global _FAST_PATH_OK
    b = x.shape[0]
    f = 1
    for d in x.shape[1:]:
        f *= d
    x2d = x.reshape(b, f)  # row-major view, no data movement

    if _FAST_PATH_OK:
        try:
            return _flatten_alias(x2d)
        except Exception:
            # Lowering/runtime issue with the no-op alias path on this
            # backend: fall back to the tiled streaming copy.
            _FAST_PATH_OK = False
    return _flatten_copy(x2d, target_block_bytes)


if __name__ == "__main__":
    # Small NCHW input consistent with a conv feature map: (B=2, C=4, H=16, W=16).
    key = jax.random.PRNGKey(0)
    x = jax.random.normal(key, (2, 4, 16, 16), dtype=jnp.float32)

    # Reference (== torch x.view(B, -1)) computed before the kernel call.
    y_ref = x.reshape(x.shape[0], -1)

    y = flatten_pallas(x)
    jax.block_until_ready(y)

    assert y.shape == (2, 4 * 16 * 16), y.shape
    assert jnp.array_equal(y, y_ref), "mismatch vs reference flatten"

    print("KERNEL_OK")
</pallas_src>

<mosaic_0001>
module attributes {stable_mosaic.version = 11 : i64} {
  func.func @_touch_kernel(%arg0: memref<2x1024xf32, #tpu.memory_space<any>>, %arg1: memref<2x1024xf32, #tpu.memory_space<any>>) attributes {dimension_semantics = [], scalar_prefetch = 0 : i64, scratch_operands = 0 : i64, tpu.core_type = #tpu.core_type<tc>} {
    return
  }
}

module attributes {stable_mosaic.version = 11 : i64} {
  func.func @_copy_kernel(%arg0: i32, %arg1: memref<2x1024xf32, #tpu.memory_space<vmem>>, %arg2: memref<2x1024xf32, #tpu.memory_space<vmem>>) attributes {dimension_semantics = [#tpu.dimension_semantics<parallel>], iteration_bounds = array<i64: 1>, scalar_prefetch = 0 : i64, scratch_operands = 0 : i64, tpu.core_type = #tpu.core_type<tc>, window_params = [{transform_indices = @transform_0, window_bounds = array<i64: 2, 1024>}, {transform_indices = @transform_1, window_bounds = array<i64: 2, 1024>}]} {
    %c0 = arith.constant 0 : index
    %c0_0 = arith.constant 0 : index
    %0 = vector.load %arg1[%c0, %c0_0] : memref<2x1024xf32, #tpu.memory_space<vmem>>, vector<2x1024xf32>
    %c0_1 = arith.constant 0 : index
    %c0_2 = arith.constant 0 : index
    %1 = vector.load %arg2[%c0_1, %c0_2] : memref<2x1024xf32, #tpu.memory_space<vmem>>, vector<2x1024xf32>
    tpu.vector_store %arg2[%c0_1, %c0_2], %0 {strides = array<i32>} : memref<2x1024xf32, #tpu.memory_space<vmem>>, vector<2x1024xf32>,
    return
  }
  func.func @transform_0(%arg0: i32) -> (i32, i32) {
    %c0_i32 = arith.constant 0 : i32
    %c0_i32_0 = arith.constant 0 : i32
    return %arg0, %c0_i32 : i32, i32
  }
  func.func @transform_1(%arg0: i32) -> (i32, i32) {
    %c0_i32 = arith.constant 0 : i32
    %c0_i32_0 = arith.constant 0 : i32
    return %arg0, %c0_i32 : i32, i32
  }
}

</mosaic_0001>

<bundles_post_ra>
// kernel: tpu_custom_call.1
= control target key start
LH: loop header
LB: loop body
LE: loop exit
PB: predicated region body
PF: predicated region fallthrough
CT: control target
= control target key end

     0   :  { %s16_s0 = inlined_call_operand.hbm [shape: f32[2,1024], index: 0, kind: input, shape index: {}, may-alias: {0,1}]   ;;  %s17_s1 = inlined_call_operand.hbm [shape: f32[2,1024], index: 1, kind: output, shape index: {}, may-alias: {0,1}]  }

// kernel: tpu_custom_call.1
= control target key start
LH: loop header
LB: loop body
LE: loop exit
PB: predicated region body
PF: predicated region fallthrough
CT: control target
= control target key end

     0   :  { %6 = vsyncpa [#allocation3], 0  ;;  %s104_s0 = inlined_call_operand.hbm [shape: f32[2,1024], index: 0, kind: input, shape index: {}, may-alias: {0,1}]   ;;  %s105_s1 = inlined_call_operand.hbm [shape: f32[2,1024], index: 1, kind: output, shape index: {}, may-alias: {0,1}]  }
   0x1   :  { %7 = vsyncpa [#allocation4], 0  ;;  %s86_s6 = smov [#allocation2]  }
   0x2   :  { %s14_s7 = sshll.u32 %s86_s6, 4  ;;  %s15_s7 = int_to_ptr.vmem [resolvable:$true] %s14_s7 }
   0x3   :  { %s50_s8 = scalar_lea.vmem %s15_s7, 256  ;;  %p55_p1 = scmp.lt.s32.totalorder %s15_s7, %s15_s7 }
   0x4   :  { %p51_p0 = scmp.ne.s32.totalorder %s15_s7, %s50_s8  ;;  %p56_p2 = scmp.lt.s32.totalorder %s50_s8, %s50_s8 }
   0x6   :  { %p57_p3 = por %p56_p2, %p55_p1 }
   0x8   :  { %p58_p4 = pnand %p57_p3, %p51_p0 }
   0xa   :  { %61 = shalt.err (!%p58_p4)
}
   0xb   :  { %17 = dma.hbm_to_vmem [thread:$0]  %s104_s0, 256, %s15_s7, [#allocation3]  }
   0xc   :  { %82 = dma.done.wait [#allocation3], 256  }
   0xd   :  { %83 = vsyncadd [#allocation3], 4294967040  ;;  %s87_s11 = smov [#allocation5]   ;;  %v21_v0 = vld [vmem:[#allocation2] sm:$0xff]  ;;  %v22_v1 = vld [vmem:[#allocation2 + $0x8] sm:$0xff] }
   0xe   :  { %s31_s12 = sshll.u32 %s87_s11, 4  ;;  %23 = vst [vmem:[#allocation5] sm:$0xff] %v21_v0  ;;  %24 = vst [vmem:[#allocation5 + $0x8] sm:$0xff] %v22_v1  ;;  %s32_s12 = int_to_ptr.vmem [resolvable:$true] %s31_s12 }
   0xf   :  { %s62_s13 = scalar_lea.vmem %s32_s12, 256  ;;  %p67_p6 = scmp.lt.s32.totalorder %s32_s12, %s32_s12 }
  0x10   :  { %p63_p5 = scmp.ne.s32.totalorder %s32_s12, %s62_s13  ;;  %p68_p7 = scmp.lt.s32.totalorder %s62_s13, %s62_s13 }
  0x12   :  { %p69_p8 = por %p68_p7, %p67_p6 }
  0x14   :  { %p70_p9 = pnand %p69_p8, %p63_p5 }
  0x16   :  { %73 = shalt.err (!%p70_p9)
}
  0x17   :  { %34 = dma.vmem_to_hbm [thread:$0]  %s32_s12, 256, %s105_s1, [#allocation4]  }
  0x18   :  { %84 = dma.done.wait [#allocation4], 256  }
  0x19   :  { %85 = vsyncadd [#allocation4], 4294967040 }
  0x1a   :  { %38 = vsyncpa [#allocation3], 1 }
  0x1b   :  { %39 = vsyncpa [#allocation4], 1 }

</bundles_post_ra>
